<compile_context>
chip_gen: v7x
topology: tpu7x:2x2x1
jax: 0.10.0
libtpu: 0.0.40
codegen_flags: <defaults>
</compile_context>

<pallas_src>
import jax
import jax.numpy as jnp
from jax import lax
from jax.experimental import pallas as pl
from jax.experimental.pallas import tpu as pltpu

IN, HID, OUT = 1, 16, 1

LANE = 128            # vreg lane width; activations are laid out (rows, 128)
CHUNK_ROWS = 64       # 8 vregs per operand chunk -> whole chain lives in vregs
MAX_ROW_BLOCK = 2048  # 1 MiB f32 tile; x2 double-buffers (in+out) ~= 4 MiB


def _round_up(n, m):
    return ((n + m - 1) // m) * m


# ---------------------------------------------------------------------------
# Parameter packing: one (4, HID) f32 slab
#   row 0: w1 (1,16) flattened     row 1: b1
#   row 2: w2 (16,1) flattened     row 3: b2 broadcast across the row
# ---------------------------------------------------------------------------
def pack_params(w1, b1, w2, b2):
    return jnp.stack(
        [
            w1.reshape(HID),
            b1.reshape(HID),
            w2.reshape(HID),
            jnp.broadcast_to(b2.reshape(-1)[0], (HID,)),
        ],
        axis=0,
    ).astype(jnp.float32)  # (4, HID)


# ---------------------------------------------------------------------------
# Small-batch kernel: single invocation, no grid, everything in VMEM.
# Only used for trivially small B (< 128), where lane padding would not pay.
# ---------------------------------------------------------------------------
def mlp_small_kernel(x_ref, p_ref, o_ref):
    p = p_ref[...]                 # (4, HID)
    x = x_ref[...]                 # (B, 1)
    w1 = p[0:1, :]                 # (1, HID)
    b1 = p[1:2, :]                 # (1, HID)
    w2 = p[2:3, :]                 # (1, HID)
    b2 = p[3:4, 0:1]               # (1, 1)
    h = jnp.maximum(x * w1 + b1, 0.0)                    # (B, HID)   VPU
    y = jnp.sum(h * w2, axis=-1, keepdims=True) + b2     # (B, 1)     VPU + XLU
    o_ref[...] = y.astype(o_ref.dtype)


def _mlp_forward_small(x, params):
    B = x.shape[0]
    return pl.pallas_call(
        mlp_small_kernel,
        out_shape=jax.ShapeDtypeStruct((B, OUT), jnp.float32),
        in_specs=[
            pl.BlockSpec(memory_space=pltpu.MemorySpace.VMEM),
            pl.BlockSpec(memory_space=pltpu.MemorySpace.VMEM),
        ],
        out_specs=pl.BlockSpec(memory_space=pltpu.MemorySpace.VMEM),
    )(x, params)


# ---------------------------------------------------------------------------
# Lane-dense batched kernel: x reshaped host-side to (rows, 128) so every vreg
# lane and every HBM tile carries useful data (unmasked vst on the output).
# Params live in SMEM (scalar reads), hidden dim fully unrolled on the VPU.
# ---------------------------------------------------------------------------
def _mlp_chain(x, p_ref):
    # Two independent accumulator chains (halves the serial add dependence);
    # b2 folded into chain 0's first term -> no trailing full-tile add.
    acc0 = jnp.maximum(x * p_ref[0, 0] + p_ref[1, 0], 0.0) * p_ref[2, 0] + p_ref[3, 0]
    acc1 = jnp.maximum(x * p_ref[0, 1] + p_ref[1, 1], 0.0) * p_ref[2, 1]
    for j in range(2, HID, 2):     # fully unrolled (HID = 16)
        acc0 = acc0 + jnp.maximum(x * p_ref[0, j] + p_ref[1, j], 0.0) * p_ref[2, j]
        acc1 = acc1 + jnp.maximum(x * p_ref[0, j + 1] + p_ref[1, j + 1], 0.0) * p_ref[2, j + 1]
    return acc0 + acc1


def mlp_lane_kernel(p_ref, x_ref, o_ref):
    rb = x_ref.shape[0]            # static (block shape)
    if rb <= CHUNK_ROWS:
        # Small tile: whole thing fits comfortably in registers.
        o_ref[...] = _mlp_chain(x_ref[...], p_ref)
    else:
        # Large tile (rb is a multiple of CHUNK_ROWS by construction): walk it
        # in 8-vreg chunks so intermediates never spill to VMEM.
        n_chunks = rb // CHUNK_ROWS

        def body(c, carry):
            i = pl.multiple_of(c * CHUNK_ROWS, CHUNK_ROWS)
            xb = x_ref[pl.ds(i, CHUNK_ROWS), :]
            o_ref[pl.ds(i, CHUNK_ROWS), :] = _mlp_chain(xb, p_ref)
            return carry

        lax.fori_loop(0, n_chunks, body, 0, unroll=2)


def _choose_row_block(rows):
    if rows <= CHUNK_ROWS:
        return rows                # single block == full array extent
    # Aim for >= 2 grid blocks so the "parallel" axis shards across both
    # TensorCores on v7x, while keeping each block as large as possible and
    # chunk-aligned for the in-kernel loop.
    half = _round_up(pl.cdiv(rows, 2), CHUNK_ROWS)
    return min(MAX_ROW_BLOCK, half)


def _mlp_forward_lane(x, params):
    B = x.shape[0]
    rows = pl.cdiv(B, LANE)
    padded = rows * LANE
    x_flat = x.reshape(B)
    if padded != B:
        # Only pad (and later slice) when B is not already lane-aligned.
        x_flat = jnp.pad(x_flat, (0, padded - B))
    x2 = x_flat.reshape(rows, LANE)

    rb = _choose_row_block(rows)
    n_blocks = pl.cdiv(rows, rb)   # ragged last block handled by Pallas

    out2 = pl.pallas_call(
        mlp_lane_kernel,
        out_shape=jax.ShapeDtypeStruct((rows, LANE), jnp.float32),
        grid=(n_blocks,),
        in_specs=[
            pl.BlockSpec(memory_space=pltpu.MemorySpace.SMEM),   # params (whole)
            pl.BlockSpec((rb, LANE), lambda i: (i, 0)),          # x row-tile
        ],
        out_specs=pl.BlockSpec((rb, LANE), lambda i: (i, 0)),
        compiler_params=pltpu.CompilerParams(
            dimension_semantics=("parallel",),   # 2-TC shard on v7x
        ),
    )(params, x2)

    out_flat = out2.reshape(padded)
    if padded != B:
        out_flat = out_flat[:B]
    return out_flat.reshape(B, OUT)


def mlp_forward(x, w1, b1, w2, b2):
    """x: (B, 1) f32 -> (B, 1) f32; same semantics as Net.forward."""
    params = pack_params(w1, b1, w2, b2)
    B = x.shape[0]
    if B >= LANE:
        return _mlp_forward_lane(x, params)
    return _mlp_forward_small(x, params)


def reference_forward(x, w1, b1, w2, b2):
    h = jnp.maximum(x @ w1 + b1, 0.0)
    return h @ w2 + b2


if __name__ == "__main__":
    key = jax.random.PRNGKey(0)
    k_w1, k_b1, k_w2, k_b2, k_x0, k_x1, k_x2 = jax.random.split(key, 7)

    w1 = jax.random.normal(k_w1, (IN, HID), dtype=jnp.float32) * 0.5
    b1 = jax.random.normal(k_b1, (1, HID), dtype=jnp.float32) * 0.1
    w2 = jax.random.normal(k_w2, (HID, OUT), dtype=jnp.float32) * 0.5
    b2 = jax.random.normal(k_b2, (1, OUT), dtype=jnp.float32) * 0.1

    fwd = jax.jit(mlp_forward)

    test_cases = [
        (8, k_x0),       # tiny batch -> gridless (B,1) VMEM kernel
        (4096, k_x1),    # lane-aligned -> single lane-dense block, no pad/slice
        (33000, k_x2),   # unaligned -> pad to 128, 2 parallel blocks, chunked,
                         # ragged last block, final slice
    ]
    for B, kx in test_cases:
        x = jax.random.normal(kx, (B, IN), dtype=jnp.float32)
        out = jax.block_until_ready(fwd(x, w1, b1, w2, b2))
        ref = reference_forward(x, w1, b1, w2, b2)
        assert out.shape == (B, OUT), f"bad shape at B={B}: {out.shape}"
        assert jnp.allclose(out, ref, atol=1e-4, rtol=1e-4), f"mismatch at B={B}"

    print("KERNEL_OK")
</pallas_src>

<mosaic_0001>
module attributes {stable_mosaic.version = 11 : i64} {
  func.func @mlp_small_kernel(%arg0: memref<8x1xf32, #tpu.memory_space<vmem>>, %arg1: memref<4x16xf32, #tpu.memory_space<vmem>>, %arg2: memref<8x1xf32, #tpu.memory_space<vmem>>) attributes {dimension_semantics = [], scalar_prefetch = 0 : i64, scratch_operands = 0 : i64, tpu.core_type = #tpu.core_type<tc>} {
    %c0 = arith.constant 0 : index
    %c0_0 = arith.constant 0 : index
    %0 = vector.load %arg1[%c0, %c0_0] : memref<4x16xf32, #tpu.memory_space<vmem>>, vector<4x16xf32>
    %c0_1 = arith.constant 0 : index
    %c0_2 = arith.constant 0 : index
    %1 = vector.load %arg0[%c0_1, %c0_2] : memref<8x1xf32, #tpu.memory_space<vmem>>, vector<8x1xf32>
    %2 = vector.extract_strided_slice %0 {offsets = [0, 0], sizes = [1, 16], strides = [1, 1]} : vector<4x16xf32> to vector<1x16xf32>
    %3 = vector.extract_strided_slice %0 {offsets = [1, 0], sizes = [1, 16], strides = [1, 1]} : vector<4x16xf32> to vector<1x16xf32>
    %4 = vector.extract_strided_slice %0 {offsets = [2, 0], sizes = [1, 16], strides = [1, 1]} : vector<4x16xf32> to vector<1x16xf32>
    %5 = vector.extract_strided_slice %0 {offsets = [3, 0], sizes = [1, 1], strides = [1, 1]} : vector<4x16xf32> to vector<1x1xf32>
    %6 = vector.broadcast %1 : vector<8x1xf32> to vector<8x16xf32>
    %7 = vector.broadcast %2 : vector<1x16xf32> to vector<8x16xf32>
    %8 = arith.mulf %6, %7 : vector<8x16xf32>
    %9 = vector.broadcast %3 : vector<1x16xf32> to vector<8x16xf32>
    %10 = arith.addf %8, %9 : vector<8x16xf32>
    %cst = arith.constant 0.000000e+00 : f32
    %11 = vector.broadcast %cst : f32 to vector<8x16xf32>
    %12 = arith.maximumf %10, %11 : vector<8x16xf32>
    %13 = vector.broadcast %4 : vector<1x16xf32> to vector<8x16xf32>
    %14 = arith.mulf %12, %13 : vector<8x16xf32>
    %cst_3 = arith.constant dense<0.000000e+00> : vector<8xf32>
    %15 = vector.multi_reduction <add>, %14, %cst_3 [1] : vector<8x16xf32> to vector<8xf32>
    %16 = vector.shape_cast %15 : vector<8xf32> to vector<8x1xf32>
    %17 = vector.broadcast %5 : vector<1x1xf32> to vector<8x1xf32>
    %18 = arith.addf %16, %17 : vector<8x1xf32>
    %c0_4 = arith.constant 0 : index
    %c0_5 = arith.constant 0 : index
    %19 = vector.load %arg2[%c0_4, %c0_5] : memref<8x1xf32, #tpu.memory_space<vmem>>, vector<8x1xf32>
    tpu.vector_store %arg2[%c0_4, %c0_5], %18 {strides = array<i32>} : memref<8x1xf32, #tpu.memory_space<vmem>>, vector<8x1xf32>,
    return
  }
}

</mosaic_0001>

<bundles_post_ra>
// kernel: mlp_forward.1
= control target key start
LH: loop header
LB: loop body
LE: loop exit
PB: predicated region body
PF: predicated region fallthrough
CT: control target
= control target key end

     0   :  { %v51_v0 = vmov 0   ;;  %v18_v2 = vlaneseq  ;;  %vm34_vm0 = vcmask 130048   ;;  %vm43_vm1 = vcmask 7168   ;;  %s76_s0 = inlined_call_operand.vmem [shape: f32[8,1], index: 0, kind: input, shape index: {}]   ;;  %s77_s1 = inlined_call_operand.vmem [shape: f32[4,16], index: 1, kind: input, shape index: {}]   ;;  %s78_s2 = inlined_call_operand.vmem [shape: f32[8,1], index: 2, kind: output, shape index: {}]  }
   0x1   :  { %50 = vset.pattern.permute.xlu0 %v51_v0  ;;  %v12_v1 = vld [vmem:[%s76_s0] sm:$0xff] }
   0x2   :  { %15 = vperm.xlu0 %50, %v12_v1   ;;  %v19_v3 = vshrl.u32 %v18_v2, 7  ;;  %v11_v5 = vld [vmem:[%s77_s1] sm:$0xf] }
   0x4   :  { %v40_v4 = vsub.s32 3, %v19_v3  ;;  %v20_v7 = vsub.s32 0, %v19_v3  ;;  %v25_v8 = vsub.s32 1, %v19_v3  ;;  %v31_v11 = vsub.s32 2, %v19_v3 }
   0x6   :  { %v41_v6 = vrot.slane %v11_v5, %v40_v4  ;;  %v21_v9 = vrot.slane %v11_v5, %v20_v7  ;;  %v26_v10 = vrot.slane %v11_v5, %v25_v8  ;;  %v32_v15 = vrot.slane %v11_v5, %v31_v11 }
  0x81   :  { %v16_v12 = vpop.permute.xlu0 %15 }
  0x82   :  { %v22_v13 = vmul.f32 %v21_v9, %v16_v12 }
  0x84   :  { %v27_v14 = vadd.f32 %v26_v10, %v22_v13 }
  0x86   :  { %v28_v16 = vmax.f32 %v27_v14, 0.0 }
  0x88   :  { %v33_v17 = vmul.f32 %v32_v15, %v28_v16 }
  0x8a   :  { %v35_v18 = vsel %vm34_vm0, %v33_v17, 0.0 }
  0x8b   :  { %36 = vadd.xlane.f32.xlu0 %v35_v18 }
 0x118   :  { %v37_v19 = vpop.xlane.xlu0 %36 }
 0x119   :  { %v42_v20 = vadd.f32 %v41_v6, %v37_v19 }
 0x11b   :  { %44 = vst.msk [vmem:[%s78_s2] sm:$0xff] %vm43_vm1, %v42_v20 }

</bundles_post_ra>
